<compile_context>
chip_gen: v5e
topology: v5e:2x2
jax: 0.10.0
libtpu: 0.0.40
codegen_flags: <defaults>
</compile_context>

<pallas_src>
import jax
import jax.numpy as jnp
from jax import lax
from jax.experimental import pallas as pl
from jax.experimental.pallas import tpu as pltpu


def mlp_kernel(x_ref, w1_ref, b1_ref, w2_ref, b2_ref, w3_ref, b3_ref, o_ref):
    # x_ref: (TB, 10) native-layout block; weights (out, in); biases (out, 1).
    act = b1_ref.dtype                      # f32 on v5e-, bf16 on v6e/v7x
    x = x_ref[...].astype(w1_ref.dtype)     # (TB, 10) -> compute dtype

    # fc1: contract the shared last (feature) dim -> (50, TB), batch on lanes.
    h1 = lax.dot_general(w1_ref[...], x, (((1,), (1,)), ((), ())),
                         preferred_element_type=act)
    h1 = jnp.maximum(h1 + b1_ref[...], 0.0).astype(w2_ref.dtype)

    # fc2 + ReLU: (10, TB)
    h2 = jnp.dot(w2_ref[...], h1, preferred_element_type=act)
    h2 = jnp.maximum(h2 + b2_ref[...], 0.0).astype(w3_ref.dtype)

    # fc3 (no activation): (1, TB); final bias stays f32.
    h3 = jnp.dot(w3_ref[...], h2, preferred_element_type=jnp.float32)
    o_ref[...] = (h3 + b3_ref[...]).astype(o_ref.dtype)


def _default_act_dtype():
    """bf16 epilogue on chips with a bf16 VALU (v6e/v7x); f32 otherwise."""
    try:
        kind = jax.devices()[0].device_kind.lower()
    except Exception:
        return jnp.float32
    if ("v6" in kind) or ("v7" in kind) or ("7x" in kind):
        return jnp.bfloat16
    return jnp.float32


def simple_nn_forward(x, params, *, batch_tile=8192,
                      compute_dtype=jnp.bfloat16, act_dtype=None):
    """x: (B, 10) float. params (PyTorch layout): w (out, in), b (out,)."""
    w1, b1, w2, b2, w3, b3 = params
    B, f_in = x.shape
    h1_dim, h2_dim, f_out = w1.shape[0], w2.shape[0], w3.shape[0]
    if act_dtype is None:
        act_dtype = _default_act_dtype()

    # Tiny, one-time casts; these stay VMEM-resident inside the kernel.
    w1k = w1.astype(compute_dtype)                     # (50, 10)
    w2k = w2.astype(compute_dtype)                     # (10, 50)
    w3k = w3.astype(compute_dtype)                     # (1, 10)
    b1k = b1.reshape(h1_dim, 1).astype(act_dtype)      # (50, 1)
    b2k = b2.reshape(h2_dim, 1).astype(act_dtype)      # (10, 1)
    b3k = b3.reshape(f_out, 1).astype(jnp.float32)     # (1, 1)  f32 always

    # Batch tile: multiple of 128 lanes; keep >= 2 grid steps when B allows it
    # (v7x megacore sharding of the "parallel" axis).  No padding of x: the
    # ragged last block (if any) is handled by Pallas (OOB reads are garbage
    # confined to columns that are never written back).
    if B <= 128:
        tb = B
    else:
        tb = min(int(batch_tile), max(128, (B // 2) // 128 * 128))
        tb = max(128, tb // 128 * 128)
    grid = (pl.cdiv(B, tb),)

    resident = lambda a: pl.BlockSpec(a.shape, lambda i: (0, 0))
    in_specs = [
        pl.BlockSpec((tb, f_in), lambda i: (i, 0)),    # x streamed, native layout
        resident(w1k), resident(b1k),
        resident(w2k), resident(b2k),
        resident(w3k), resident(b3k),
    ]
    out_specs = pl.BlockSpec((f_out, tb), lambda i: (0, i))

    flops = 2 * B * (f_in * h1_dim + h1_dim * h2_dim + h2_dim * f_out)
    bytes_accessed = (int(x.size) * x.dtype.itemsize + B * f_out * 4
                      + sum(int(a.size) * a.dtype.itemsize
                            for a in (w1k, b1k, w2k, b2k, w3k, b3k)))

    # VMEM estimate: x block lane-pads f_in -> 128 (tb*128*itemsize per
    # buffer, double-buffered); out block sublane-pads 1 -> 8.  Default tb
    # (<= 8192) fits the 16 MiB v5e scoped default; raise the limit otherwise.
    vmem_need = 2 * tb * 128 * x.dtype.itemsize + 2 * tb * 8 * 4 + (1 << 20)
    cparams = dict(dimension_semantics=("parallel",))
    if vmem_need > 12 * 1024 * 1024:
        cparams["vmem_limit_bytes"] = int(vmem_need)

    out_t = pl.pallas_call(
        mlp_kernel,
        out_shape=jax.ShapeDtypeStruct((f_out, B), jnp.float32),
        grid=grid,
        in_specs=in_specs,
        out_specs=out_specs,
        compiler_params=pltpu.CompilerParams(**cparams),
        cost_estimate=pl.CostEstimate(flops=int(flops), transcendentals=0,
                                      bytes_accessed=int(bytes_accessed)),
    )(x, w1k, b1k, w2k, b2k, w3k, b3k)

    # (1, B) lane-dense kernel output -> PyTorch (B, 1).  Free reshape
    # (degenerate transpose) because f_out == 1.
    if f_out == 1:
        return out_t.reshape(B, 1)
    return out_t.T


def init_params(key):
    # PyTorch nn.Linear default init: U[-1/sqrt(fan_in), 1/sqrt(fan_in)],
    # weight stored (out_features, in_features).
    def linear(key, fan_in, fan_out):
        kw, kb = jax.random.split(key)
        bound = 1.0 / jnp.sqrt(fan_in)
        w = jax.random.uniform(kw, (fan_out, fan_in), jnp.float32, -bound, bound)
        b = jax.random.uniform(kb, (fan_out,), jnp.float32, -bound, bound)
        return w, b

    k1, k2, k3 = jax.random.split(key, 3)
    w1, b1 = linear(k1, 10, 50)
    w2, b2 = linear(k2, 50, 10)
    w3, b3 = linear(k3, 10, 1)
    return (w1, b1, w2, b2, w3, b3)


if __name__ == "__main__":
    key = jax.random.PRNGKey(0)
    k_params, k_x = jax.random.split(key)
    params = init_params(k_params)

    B = 512  # small demo batch; batch_tile=256 -> 2 pipelined grid steps
    x = jax.random.normal(k_x, (B, 10), jnp.float32)

    fwd = jax.jit(lambda xx: simple_nn_forward(xx, params, batch_tile=256))
    out = jax.block_until_ready(fwd(x))
    assert out.shape == (B, 1), out.shape

    # Pure f32 reference; tolerance covers the intentional bf16 quantization
    # of x / weights / intermediate activations inside the kernel.
    w1, b1, w2, b2, w3, b3 = params
    ref = jnp.maximum(x @ w1.T + b1, 0.0)
    ref = jnp.maximum(ref @ w2.T + b2, 0.0)
    ref = (ref @ w3.T + b3).reshape(B, 1)
    max_err = float(jnp.max(jnp.abs(out - ref)))
    assert jnp.allclose(out, ref, atol=5e-2, rtol=5e-2), max_err

    print("KERNEL_OK")
</pallas_src>

<mosaic_0001>
module attributes {stable_mosaic.version = 11 : i64} {
  func.func @mlp_kernel(%arg0: i32, %arg1: memref<256x10xf32, #tpu.memory_space<vmem>>, %arg2: memref<50x10xbf16, #tpu.memory_space<vmem>>, %arg3: memref<50x1xf32, #tpu.memory_space<vmem>>, %arg4: memref<10x50xbf16, #tpu.memory_space<vmem>>, %arg5: memref<10x1xf32, #tpu.memory_space<vmem>>, %arg6: memref<1x10xbf16, #tpu.memory_space<vmem>>, %arg7: memref<1x1xf32, #tpu.memory_space<vmem>>, %arg8: memref<1x256xf32, #tpu.memory_space<vmem>>) attributes {dimension_semantics = [#tpu.dimension_semantics<parallel>], iteration_bounds = array<i64: 2>, scalar_prefetch = 0 : i64, scratch_operands = 0 : i64, tpu.core_type = #tpu.core_type<tc>, window_params = [{transform_indices = @transform_0, window_bounds = array<i64: 256, 10>}, {pipeline_mode = #tpu.pipeline_mode<synchronous>, transform_indices = @transform_1, window_bounds = array<i64: 50, 10>}, {pipeline_mode = #tpu.pipeline_mode<synchronous>, transform_indices = @transform_2, window_bounds = array<i64: 50, 1>}, {pipeline_mode = #tpu.pipeline_mode<synchronous>, transform_indices = @transform_3, window_bounds = array<i64: 10, 50>}, {pipeline_mode = #tpu.pipeline_mode<synchronous>, transform_indices = @transform_4, window_bounds = array<i64: 10, 1>}, {pipeline_mode = #tpu.pipeline_mode<synchronous>, transform_indices = @transform_5, window_bounds = array<i64: 1, 10>}, {pipeline_mode = #tpu.pipeline_mode<synchronous>, transform_indices = @transform_6, window_bounds = array<i64: 1, 1>}, {transform_indices = @transform_7, window_bounds = array<i64: 1, 256>}]} {
    %c0 = arith.constant 0 : index
    %c0_0 = arith.constant 0 : index
    %0 = vector.load %arg1[%c0, %c0_0] : memref<256x10xf32, #tpu.memory_space<vmem>>, vector<256x10xf32>
    %1 = arith.truncf %0 : vector<256x10xf32> to vector<256x10xbf16>
    %c0_1 = arith.constant 0 : index
    %c0_2 = arith.constant 0 : index
    %2 = vector.load %arg2[%c0_1, %c0_2] : memref<50x10xbf16, #tpu.memory_space<vmem>>, vector<50x10xbf16>
    %cst = arith.constant dense<0.000000e+00> : vector<50x256xf32>
    %3 = tpu.matmul %2, %1, %cst {dimension_numbers = #tpu.dot_dimension_numbers<[1], [1], [0], [0], [0, 0, 1, 0], [], []>} : vector<50x10xbf16>, vector<256x10xbf16>, vector<50x256xf32> -> vector<50x256xf32>
    %c0_3 = arith.constant 0 : index
    %c0_4 = arith.constant 0 : index
    %4 = vector.load %arg3[%c0_3, %c0_4] : memref<50x1xf32, #tpu.memory_space<vmem>>, vector<50x1xf32>
    %5 = vector.broadcast %4 : vector<50x1xf32> to vector<50x256xf32>
    %6 = arith.addf %3, %5 : vector<50x256xf32>
    %cst_5 = arith.constant 0.000000e+00 : f32
    %7 = vector.broadcast %cst_5 : f32 to vector<50x256xf32>
    %8 = arith.maximumf %6, %7 : vector<50x256xf32>
    %9 = arith.truncf %8 : vector<50x256xf32> to vector<50x256xbf16>
    %c0_6 = arith.constant 0 : index
    %c0_7 = arith.constant 0 : index
    %10 = vector.load %arg4[%c0_6, %c0_7] : memref<10x50xbf16, #tpu.memory_space<vmem>>, vector<10x50xbf16>
    %cst_8 = arith.constant dense<0.000000e+00> : vector<10x256xf32>
    %11 = tpu.matmul %10, %9, %cst_8 {dimension_numbers = #tpu.dot_dimension_numbers<[1], [0], [0], [1], [0, 0, 1, 1], [], []>} : vector<10x50xbf16>, vector<50x256xbf16>, vector<10x256xf32> -> vector<10x256xf32>
    %c0_9 = arith.constant 0 : index
    %c0_10 = arith.constant 0 : index
    %12 = vector.load %arg5[%c0_9, %c0_10] : memref<10x1xf32, #tpu.memory_space<vmem>>, vector<10x1xf32>
    %13 = vector.broadcast %12 : vector<10x1xf32> to vector<10x256xf32>
    %14 = arith.addf %11, %13 : vector<10x256xf32>
    %cst_11 = arith.constant 0.000000e+00 : f32
    %15 = vector.broadcast %cst_11 : f32 to vector<10x256xf32>
    %16 = arith.maximumf %14, %15 : vector<10x256xf32>
    %17 = arith.truncf %16 : vector<10x256xf32> to vector<10x256xbf16>
    %c0_12 = arith.constant 0 : index
    %c0_13 = arith.constant 0 : index
    %18 = vector.load %arg6[%c0_12, %c0_13] : memref<1x10xbf16, #tpu.memory_space<vmem>>, vector<1x10xbf16>
    %cst_14 = arith.constant dense<0.000000e+00> : vector<1x256xf32>
    %19 = tpu.matmul %18, %17, %cst_14 {dimension_numbers = #tpu.dot_dimension_numbers<[1], [0], [0], [1], [0, 0, 1, 1], [], []>} : vector<1x10xbf16>, vector<10x256xbf16>, vector<1x256xf32> -> vector<1x256xf32>
    %c0_15 = arith.constant 0 : index
    %c0_16 = arith.constant 0 : index
    %20 = vector.load %arg7[%c0_15, %c0_16] : memref<1x1xf32, #tpu.memory_space<vmem>>, vector<1x1xf32>
    %21 = vector.broadcast %20 : vector<1x1xf32> to vector<1x256xf32>
    %22 = arith.addf %19, %21 : vector<1x256xf32>
    %c0_17 = arith.constant 0 : index
    %c0_18 = arith.constant 0 : index
    %23 = vector.load %arg8[%c0_17, %c0_18] : memref<1x256xf32, #tpu.memory_space<vmem>>, vector<1x256xf32>
    tpu.vector_store %arg8[%c0_17, %c0_18], %22 {strides = array<i32>} : memref<1x256xf32, #tpu.memory_space<vmem>>, vector<1x256xf32>,
    return
  }
  func.func @transform_0(%arg0: i32) -> (i32, i32) {
    %c0_i32 = arith.constant 0 : i32
    %c0_i32_0 = arith.constant 0 : i32
    return %arg0, %c0_i32 : i32, i32
  }
  func.func @transform_1(%arg0: i32) -> (i32, i32) {
    %c0_i32 = arith.constant 0 : i32
    %c0_i32_0 = arith.constant 0 : i32
    %c0_i32_1 = arith.constant 0 : i32
    return %c0_i32, %c0_i32_0 : i32, i32
  }
  func.func @transform_2(%arg0: i32) -> (i32, i32) {
    %c0_i32 = arith.constant 0 : i32
    %c0_i32_0 = arith.constant 0 : i32
    %c0_i32_1 = arith.constant 0 : i32
    return %c0_i32, %c0_i32_0 : i32, i32
  }
  func.func @transform_3(%arg0: i32) -> (i32, i32) {
    %c0_i32 = arith.constant 0 : i32
    %c0_i32_0 = arith.constant 0 : i32
    %c0_i32_1 = arith.constant 0 : i32
    return %c0_i32, %c0_i32_0 : i32, i32
  }
  func.func @transform_4(%arg0: i32) -> (i32, i32) {
    %c0_i32 = arith.constant 0 : i32
    %c0_i32_0 = arith.constant 0 : i32
    %c0_i32_1 = arith.constant 0 : i32
    return %c0_i32, %c0_i32_0 : i32, i32
  }
  func.func @transform_5(%arg0: i32) -> (i32, i32) {
    %c0_i32 = arith.constant 0 : i32
    %c0_i32_0 = arith.constant 0 : i32
    %c0_i32_1 = arith.constant 0 : i32
    return %c0_i32, %c0_i32_0 : i32, i32
  }
  func.func @transform_6(%arg0: i32) -> (i32, i32) {
    %c0_i32 = arith.constant 0 : i32
    %c0_i32_0 = arith.constant 0 : i32
    %c0_i32_1 = arith.constant 0 : i32
    return %c0_i32, %c0_i32_0 : i32, i32
  }
  func.func @transform_7(%arg0: i32) -> (i32, i32) {
    %c0_i32 = arith.constant 0 : i32
    %c0_i32_0 = arith.constant 0 : i32
    return %c0_i32, %arg0 : i32, i32
  }
}

</mosaic_0001>

<bundles_post_ra>
// kernel: _lambda_.1
= control target key start
LH: loop header
LB: loop body
LE: loop exit
PB: predicated region body
PF: predicated region fallthrough
CT: control target
= control target key end

     0   :  { %s1135_s0 = inlined_call_operand.vmem [shape: f32[512,10], index: 0, kind: input, shape index: {}]   ;;  %s1136_s1 = inlined_call_operand.vmem [shape: bf16[50,10], index: 1, kind: input, shape index: {}]   ;;  %s1137_s2 = inlined_call_operand.vmem [shape: f32[50,1], index: 2, kind: input, shape index: {}]   ;;  %s1138_s3 = inlined_call_operand.vmem [shape: bf16[10,50], index: 3, kind: input, shape index: {}]   ;;  %s1139_s4 = inlined_call_operand.vmem [shape: f32[10,1], index: 4, kind: input, shape index: {}]   ;;  %s1140_s5 = inlined_call_operand.vmem [shape: bf16[1,10], index: 5, kind: input, shape index: {}]   ;;  %s1141_s6 = inlined_call_operand.<no memory space> [shape: f32[1,1], index: 6, kind: input, shape index: {}]   ;;  %s1142_s7 = inlined_call_operand.hbm [shape: f32[1,512], index: 7, kind: output, shape index: {}]  }
   0x1   :  { %v12_v0 = vstv %s1141_s6 }
   0x2   :  { %13 = vst [vmem:[#allocation2] sm:$0x1] %v12_v0 }
   0x3   :  { %14 = vsyncpa [#allocation4], 0 }
   0x4   :  { %16 = vsyncpa [#allocation4 + $0x1], 0  ;;  %s940_s26 = smov 0   ;;  %s942_s27 = smov 0  }
   0x5   :  { %s944_s28 = smov 0   ;;  %s946_s29 = smov 0  }
   0x6 LB: > { %s961_s6 = sadd.s32 4294967295, %s894_s29   ;;  %s730_s30 = sadd.s32 4294967294, %s894_s29   ;;  %s894_s29 = sphi %s946_s29, %s1148_s29   ;;  %s890_s28 = sphi %s944_s28, %s1147_s28   ;;  %s886_s27 = sphi %s942_s27, %s1146_s27   ;;  %s882_s26 = sphi %s940_s26, %s1145_s26  }
   0x7   : > { %s965_s8 = sadd.s32 1, %s894_s29   ;;  %s181_s9 = sadd.s32 1, %s890_s28 }
   0x8   : > { %s178_s10 = ssub.s32 %s894_s29, %s965_s8  ;;  %p191_p0 = scmp.ne.s32.totalorder %s890_s28, %s886_s27 }
   0x9   : > { %p179_p1 = scmp.eq.s32.totalorder %s178_s10, 0  ;;  %p192_p2 = scmp.eq.s32.totalorder %s961_s6, 1 }
   0xa   : > { %p197_p3 = scmp.ne.s32.totalorder %s886_s27, %s882_s26  ;;  %p198_p4 = scmp.eq.s32.totalorder %s730_s30, 1 }
   0xb   : > { %s976_s11 = scalar_select %p179_p1, %s890_s28, %s181_s9  }
   0xc   : > { %p978_p5 = por %p192_p2, %p191_p0  ;;  %p982_p6 = por %p198_p4, %p197_p3 }
   0xd   : > { %p733_p7 = scmp.ge.s32.totalorder %s894_s29, 1  ;;  %p243_p8 = scmp.lt.s32.totalorder %s894_s29, 3 }
   0xf   : > { %p244_p9 = pnand %p733_p7, %p243_p8 }
  0x10   : > { %s735_s14 = sshll.u32 (!%p244_p9), %s961_s6, 5  ;;  %s272_s21 = sand.u32 (!%p244_p9), 1, %s886_s27  }
  0x11   : > { %247 = sbr.rel (%p244_p9) target bundleno = 567 (0x237), region = 48  ;;  %p276_p10 = scmp.lt.s32.totalorder (!%p244_p9), %s735_s14, 63 }
  0x12   : > { %s734_s22 = sshll.u32 (!%p244_p9), %s272_s21, 1  ;;  %s766_s23 = sshll.u32 (!%p244_p9), %s961_s6, 1 }
  0x13   : > { %s666_s30 = scalar_lea.hbm (!%p244_p9), %s1142_s7, %s766_s23  ;;  %s274_s9 = scalar_lea.vmem (!%p244_p9), [#allocation3], %s734_s22 }
  0x14   : > { %s668_s10 = sshll.u32 (!%p244_p9), %s274_s9, 4  ;;  %s656_s6 = scalar_lea.sflag (!%p244_p9), [#allocation4], %s272_s21  ;;  %s669_s10 = int_to_ptr.vmem [resolvable:$true] %s668_s10 }
  0x15   : > { %s852_s19 = scalar_lea.hbm (!%p244_p9), %s1142_s7, 4 }
  0x16   : > { %s1150_s14 = smov (!%p276_p10, %s735_s14), 63  ;;  %vm398_vm0 = vcmask 80896   ;;  %v344_v45 = vld [vmem:[%s1137_s2 + $0x30] sm:$0x3]  ;;  %v896_v48 = vmov 0   ;;  %v342_v55 = vld [vmem:[%s1137_s2 + $0x20] sm:$0xff] }
  0x17   : > { %s736_s15 = sshll.u32 %s1150_s14, 3  ;;  %829 = vset.pattern.permute.xlu0 %v896_v48  ;;  %830 = vset.pattern.permute.xlu1 %v896_v48  ;;  %v343_v0 = vld [vmem:[%s1137_s2 + $0x28] sm:$0xff]  ;;  %vm560_vm1 = vcmask 1040384   ;;  %vm556_vm2 = vcmask 408576   ;;  %vm612_vm3 = vcmask 1044480   ;;  %s670_s14 = sshll.u32 %s666_s30, 4  ;;  %s671_s14 = int_to_ptr.hbm [resolvable:$true] %s670_s14 }
  0x18   : > { %s992_s18 = scalar_lea.vmem %s1135_s0, %s736_s15  ;;  %377 = vperm.xlu0 %829, %v344_v45   ;;  %831 = vset.pattern.permute.xlu2 %v896_v48  ;;  %s846_s15 = sshra.s32 %s671_s14, 4  ;;  %s847_s15 = int_to_ptr.hbm [resolvable:$true] %s846_s15 }
  0x19   : > { %v297_v1 = vld [vmem:[%s992_s18 + $0x70] sm:$0xff]  ;;  %v298_v2 = vld [vmem:[%s992_s18 + $0x78] sm:$0xff]  ;;  %v295_v7 = vld [vmem:[%s992_s18 + $0x60] sm:$0xff]  ;;  %372 = vperm.xlu1 %830, %v343_v0   ;;  %s848_s16 = scalar_lea.hbm %s847_s15, 2  ;;  %p853_p0 = scmp.lt.s32.totalorder %s847_s15, %s1142_s7 }
  0x1a   : > { %v313_v3 = vld [vmem:[%s992_s18 + $0xf0] sm:$0xff]  ;;  %v322_v4 = vpack.c.bf16 %v298_v2, %v297_v1  ;;  %v314_v5 = vld [vmem:[%s992_s18 + $0xf8] sm:$0xff]  ;;  %v296_v8 = vld [vmem:[%s992_s18 + $0x68] sm:$0xff]  ;;  %p849_p11 = scmp.ne.s32.totalorder %s847_s15, %s848_s16  ;;  %p854_p1 = scmp.lt.s32.totalorder %s852_s19, %s848_s16 }
  0x1b   : > { %v330_v6 = vpack.c.bf16 %v314_v5, %v313_v3  ;;  %v311_v10 = vld [vmem:[%s992_s18 + $0xe0] sm:$0xff]  ;;  %v312_v11 = vld [vmem:[%s992_s18 + $0xe8] sm:$0xff]  ;;  %v321_v13 = vpack.c.bf16 %v296_v8, %v295_v7  ;;  %v293_v17 = vld [vmem:[%s992_s18 + $0x50] sm:$0xff] }
  0x1c   : > { %v433_v9 = vsel %vm398_vm0, %v322_v4, 0  ;;  %v329_v14 = vpack.c.bf16 %v312_v11, %v311_v10  ;;  %v294_v18 = vld [vmem:[%s992_s18 + $0x58] sm:$0xff]  ;;  %v309_v19 = vld [vmem:[%s992_s18 + $0xd0] sm:$0xff]  ;;  %v291_v25 = vld [vmem:[%s992_s18 + $0x40] sm:$0xff]  ;;  %p850_p12 = pnand %p849_p11, %p978_p5  ;;  %p855_p2 = por %p854_p1, %p853_p0 }
  0x1d   : > { %459 = vmatpush.bf16.xpose.msra.mxu0 %v433_v9  ;;  %v457_v12 = vsel %vm398_vm0, %v330_v6, 0  ;;  %773 = vmatpush.bf16.xpose.msra.mxu2 %v433_v9  ;;  %v430_v15 = vsel %vm398_vm0, %v321_v13, 0  ;;  %v310_v20 = vld [vmem:[%s992_s18 + $0xd8] sm:$0xff]  ;;  %v320_v21 = vpack.c.bf16 %v294_v18, %v293_v17  ;;  %v292_v26 = vld [vmem:[%s992_s18 + $0x48] sm:$0xff]  ;;  %v307_v27 = vld [vmem:[%s992_s18 + $0xc0] sm:$0xff] }
  0x1e   : > { %487 = vmatpush.bf16.xpose.msra.mxu1 %v457_v12  ;;  %781 = vmatpush.bf16.xpose.msra.mxu3 %v457_v12  ;;  %v454_v16 = vsel %vm398_vm0, %v329_v14, 0  ;;  %v328_v22 = vpack.c.bf16 %v310_v20, %v309_v19  ;;  %v308_v28 = vld [vmem:[%s992_s18 + $0xc8] sm:$0xff]  ;;  %v319_v29 = vpack.c.bf16 %v292_v26, %v291_v25  ;;  %v289_v33 = vld [vmem:[%s992_s18 + $0x30] sm:$0xff]  ;;  %v290_v34 = vld [vmem:[%s992_s18 + $0x38] sm:$0xff]  ;;  %p851_p13 = pneg %p850_p12 }
  0x1f   : > { %v427_v23 = vsel %vm398_vm0, %v320_v21, 0  ;;  %v327_v30 = vpack.c.bf16 %v308_v28, %v307_v27  ;;  %v305_v35 = vld [vmem:[%s992_s18 + $0xb0] sm:$0xff]  ;;  %v306_v36 = vld [vmem:[%s992_s18 + $0xb8] sm:$0xff]  ;;  %v318_v37 = vpack.c.bf16 %v290_v34, %v289_v33  ;;  %v287_v41 = vld [vmem:[%s992_s18 + $0x20] sm:$0xff] }
  0x20   : > { %v451_v24 = vsel %vm398_vm0, %v328_v22, 0  ;;  %v424_v31 = vsel %vm398_vm0, %v319_v29, 0  ;;  %v326_v38 = vpack.c.bf16 %v306_v36, %v305_v35  ;;  %v288_v42 = vld [vmem:[%s992_s18 + $0x28] sm:$0xff]  ;;  %v303_v43 = vld [vmem:[%s992_s18 + $0xa0] sm:$0xff]  ;;  %v285_v51 = vld [vmem:[%s992_s18 + $0x10] sm:$0xff]  ;;  %367 = vperm.xlu0 %829, %v342_v55   ;;  %p856_p3 = pnand %p855_p2, %p851_p13 }
  0x21   : > { %v448_v32 = vsel %vm398_vm0, %v327_v30, 0  ;;  %v421_v39 = vsel %vm398_vm0, %v318_v37, 0  ;;  %v304_v44 = vld [vmem:[%s992_s18 + $0xa8] sm:$0xff]  ;;  %v317_v46 = vpack.c.bf16 %v288_v42, %v287_v41  ;;  %v286_v52 = vld [vmem:[%s992_s18 + $0x18] sm:$0xff]  ;;  %v301_v53 = vld [vmem:[%s992_s18 + $0x90] sm:$0xff] }
  0x22   : > { %v445_v40 = vsel %vm398_vm0, %v326_v38, 0  ;;  %v325_v47 = vpack.c.bf16 %v304_v44, %v303_v43  ;;  %v302_v54 = vld [vmem:[%s992_s18 + $0x98] sm:$0xff]  ;;  %v316_v56 = vpack.c.bf16 %v286_v52, %v285_v51  ;;  %v283_v60 = vld [vmem:[%s992_s18] sm:$0xff]  ;;  %v284_v61 = vld [vmem:[%s992_s18 + $0x8] sm:$0xff] }
  0x23   : > { %v418_v49 = vsel %vm398_vm0, %v317_v46, 0  ;;  %v324_v57 = vpack.c.bf16 %v302_v54, %v301_v53  ;;  %v299_v62 = vld [vmem:[%s992_s18 + $0x80] sm:$0xff]  ;;  %v300_v63 = vld [vmem:[%s992_s18 + $0x88] sm:$0xff]  ;;  %v315_v2 = vpack.c.bf16 %v284_v61, %v283_v60  ;;  %v341_v3 = vld [vmem:[%s1137_s2 + $0x18] sm:$0xff] }
  0x24   : > { %v442_v50 = vsel %vm398_vm0, %v325_v47, 0  ;;  %v415_v58 = vsel %vm398_vm0, %v316_v56, 0  ;;  %v339_v1 = vld [vmem:[%s1137_s2 + $0x8] sm:$0xff]  ;;  %v323_v4 = vpack.c.bf16 %v300_v63, %v299_v62  ;;  %362 = vperm.xlu2 %831, %v341_v3   ;;  %v337_v5 = vld [vmem:[%s1136_s1 + $0x18] sm:$0x1]  ;;  %v340_v9 = vld [vmem:[%s1137_s2 + $0x10] sm:$0xff] }
  0x25   : > { %460 = vmatpush.bf16.xpose.msra.mxu0 %v430_v15  ;;  %774 = vmatpush.bf16.xpose.msra.mxu2 %v430_v15  ;;  %v439_v59 = vsel %vm398_vm0, %v324_v57, 0  ;;  %v412_v6 = vsel %vm398_vm0, %v315_v2, 0  ;;  %v393_v8 = vunpack.c.l.b16 %v337_v5  ;;  %v769_v10 = vld [vmem:[%s1136_s1] sm:$0xff]  ;;  %v540_v15 = vld [vmem:[%s1139_s4 + $0x8] sm:$0x3]  ;;  %v771_v17 = vld [vmem:[%s1136_s1 + $0x10] sm:$0xff] }
  0x26   : > { %488 = vmatpush.bf16.xpose.msra.mxu1 %v454_v16  ;;  %782 = vmatpush.bf16.xpose.msra.mxu3 %v454_v16  ;;  %v436_v7 = vsel %vm398_vm0, %v323_v4, 0  ;;  %v338_v12 = vld [vmem:[%s1137_s2] sm:$0xff]  ;;  %v770_v16 = vld [vmem:[%s1136_s1 + $0x8] sm:$0xff] }
  0x27   : > { %357 = vperm.xlu1 %830, %v340_v9   ;;  %v397_v11 = vpack.c.b16 %v393_v8, %v393_v8  ;;  %v602_v13 = vld [vmem:[#allocation2] sm:$0x1] }
  0x28   : > { %352 = vperm.xlu0 %829, %v339_v1   ;;  %v539_v14 = vld [vmem:[%s1139_s4] sm:$0xff] }
  0x2c   : > { %347 = vperm.xlu2 %831, %v338_v12   ;;  %v759_v12 = vld [vmem:[%s1138_s3] sm:$0xf] }
  0x2d   : > { %461 = vmatpush.bf16.xpose.msra.mxu0 %v427_v23  ;;  %775 = vmatpush.bf16.xpose.msra.mxu2 %v427_v23 }
  0x2e   : > { %489 = vmatpush.bf16.xpose.msra.mxu1 %v451_v24  ;;  %783 = vmatpush.bf16.xpose.msra.mxu3 %v451_v24 }
  0x2f   : > { %543 = vperm.xlu1 %830, %v539_v14  }
  0x30   : > { %605 = vperm.xlu0 %829, %v602_v13   ;;  %v772_v13 = vld [vmem:[%s1138_s3] sm:$0x10] }
  0x34   : > { %548 = vperm.xlu2 %831, %v540_v15  }
  0x35   : > { %462 = vmatpush.bf16.xpose.msra.mxu0 %v424_v31  ;;  %776 = vmatpush.bf16.xpose.msra.mxu2 %v424_v31 }
  0x36   : > { %490 = vmatpush.bf16.xpose.msra.mxu1 %v448_v32  ;;  %784 = vmatpush.bf16.xpose.msra.mxu3 %v448_v32 }
  0x3d   : > { %463 = vmatpush.bf16.xpose.msra.mxu0 %v421_v39  ;;  %777 = vmatpush.bf16.xpose.msra.mxu2 %v421_v39 }
  0x3e   : > { %491 = vmatpush.bf16.xpose.msra.mxu1 %v445_v40  ;;  %785 = vmatpush.bf16.xpose.msra.mxu3 %v445_v40 }
  0x45   : > { %464 = vmatpush.bf16.xpose.msra.mxu0 %v418_v49  ;;  %778 = vmatpush.bf16.xpose.msra.mxu2 %v418_v49 }
  0x46   : > { %492 = vmatpush.bf16.xpose.msra.mxu1 %v442_v50  ;;  %786 = vmatpush.bf16.xpose.msra.mxu3 %v442_v50 }
  0x4d   : > { %465 = vmatpush.bf16.xpose.msra.mxu0 %v415_v58  ;;  %779 = vmatpush.bf16.xpose.msra.mxu2 %v415_v58 }
  0x4e   : > { %493 = vmatpush.bf16.xpose.msra.mxu1 %v439_v59  ;;  %787 = vmatpush.bf16.xpose.msra.mxu3 %v439_v59 }
  0x55   : > { %466 = vmatpush.bf16.xpose.msra.mxu0 %v412_v6  ;;  %780 = vmatpush.bf16.xpose.msra.mxu2 %v412_v6 }
  0x56   : > { %494 = vmatpush.bf16.xpose.msra.mxu1 %v436_v7  ;;  %788 = vmatpush.bf16.xpose.msra.mxu3 %v436_v7 }
  0x5c   : > { %749 = vmatmul.msk.bf16.vlgmr.msra.gmra.mxu0 %vm398_vm0, %v769_v10  ;;  %752 = vmatmul.msk.bf16.vlgmr.msra.gmra.mxu2 %vm398_vm0, %v397_v11 }
  0x5d   : > { %753 = vmatmul.msk.bf16.vlgmr.msra.gmra.mxu1 %vm398_vm0, %v769_v10  ;;  %756 = vmatmul.msk.bf16.vlgmr.msra.gmra.mxu3 %vm398_vm0, %v397_v11 }
  0x6c   : > { %750 = vmatmul.msk.bf16.gmra.mxu0 %vm398_vm0, %v770_v16 }
  0x6d   : > { %754 = vmatmul.msk.bf16.gmra.mxu1 %vm398_vm0, %v770_v16 }
  0x7c   : > { %751 = vmatmul.msk.bf16.gmra.mxu0 %vm398_vm0, %v771_v17 }
  0x7d   : > { %755 = vmatmul.msk.bf16.gmra.mxu1 %vm398_vm0, %v771_v17  ;;  %v760_v17 = vor.u32 %v772_v13, %v759_v12 }
  0x7e   : > { %v363_v43 = vpop.permute.xlu2 %362 }
  0x86   : > { %v348_v57 = vpop.permute.xlu2 %347 }
  0x8a   : > { %v378_v20 = vpop.permute.xlu0 %377 }
  0x8b   : > { %v373_v39 = vpop.permute.xlu1 %372 }
  0x92   : > { %v368_v40 = vpop.permute.xlu0 %367 }
  0x99   : > { %v358_v45 = vpop.permute.xlu1 %357 }
  0x9a   : > { %v353_v51 = vpop.permute.xlu0 %352 }
  0xd9   : > { %v468_v18 = vpop.f32.mrf.mxu0 }
  0xda   : > { %v496_v19 = vpop.f32.mrf.mxu1  ;;  %v469_v3 = vadd.f32 %v468_v18, %v348_v57 }
  0xdb   : > { %v497_v5 = vadd.f32 %v496_v19, %v348_v57 }
  0xdc   : > { %v515_v11 = vmax.f32 %v469_v3, 0.0 }
  0xdd   : > { %v516_v14 = vmax.f32 %v497_v5, 0.0 }
  0xdf   : > { %v483_v21 = vpop.f32.mrf.mxu2 }
  0xe0   : > { %v484_v22 = vadd.f32 %v483_v21, %v378_v20  ;;  %v511_v23 = vpop.f32.mrf.mxu3 }
  0xe1   : > { %v470_v24 = vpop.f32.mrf.mxu0  ;;  %v512_v25 = vadd.f32 %v511_v23, %v378_v20  ;;  %v544_v20 = vpop.permute.xlu1 %543 }
  0xe2   : > { %v498_v26 = vpop.f32.mrf.mxu1  ;;  %v527_v27 = vmax.f32 %v484_v22, 0.0  ;;  %v471_v61 = vadd.f32 %v470_v24, %v353_v51  ;;  %v549_v22 = vpop.permute.xlu2 %548 }
  0xe3   : > { %v528_v28 = vmax.f32 %v512_v25, 0.0  ;;  %v499_v0 = vadd.f32 %v498_v26, %v353_v51 }
  0xe4   : > { %v535_v29 = vpack.c.bf16 %v527_v27, %v527_v27  ;;  %v517_v7 = vmax.f32 %v471_v61, 0.0 }
  0xe5   : > { %v536_v30 = vpack.c.bf16 %v528_v28, %v528_v28  ;;  %v518_v9 = vmax.f32 %v499_v0, 0.0 }
  0xe6   : > { %v562_v31 = vsel %vm560_vm1, %v535_v29, 0  ;;  %v529_v15 = vpack.c.bf16 %v517_v7, %v515_v11 }
  0xe7   : > { %v485_v32 = vpop.f32.mrf.mxu2  ;;  %571 = vmatpush.bf16.msrb.mxu2 %v562_v31  ;;  %v565_v33 = vsel %vm560_vm1, %v536_v30, 0  ;;  %v530_v16 = vpack.c.bf16 %v518_v9, %v516_v14 }
  0xe8   : > { %v513_v34 = vpop.f32.mrf.mxu3  ;;  %585 = vmatpush.bf16.msrb.mxu3 %v565_v33 }
  0xe9   : > { %v473_v35 = vpop.f32.mrf.mxu0 }
  0xea   : > { %v501_v36 = vpop.f32.mrf.mxu1  ;;  %v474_v54 = vadd.f32 %v473_v35, %v358_v45 }
  0xeb   : > { %v502_v58 = vadd.f32 %v501_v36, %v358_v45  ;;  %v601_v36 = vld [vmem:[%s1140_s5] sm:$0x1] }
  0xec   : > { %v519_v4 = vmax.f32 %v474_v54, 0.0 }
  0xed   : > { %v520_v6 = vmax.f32 %v502_v58, 0.0 }
  0xf1   : > { %v475_v37 = vpop.f32.mrf.mxu0 }
  0xf2   : > { %v503_v38 = vpop.f32.mrf.mxu1  ;;  %v476_v48 = vadd.f32 %v475_v37, %v363_v43  ;;  %v606_v37 = vpop.permute.xlu0 %605 }
  0xf3   : > { %v504_v52 = vadd.f32 %v503_v38, %v363_v43  ;;  %v608_v38 = vperm.slane %v606_v37, 0 }
  0xf4   : > { %v521_v62 = vmax.f32 %v476_v48, 0.0 }
  0xf5   : > { %v522_v1 = vmax.f32 %v504_v52, 0.0 }
  0xf6   : > { %v531_v8 = vpack.c.bf16 %v521_v62, %v519_v4 }
  0xf7   : > { %v532_v10 = vpack.c.bf16 %v522_v1, %v520_v6 }
  0xf9   : > { %v478_v41 = vpop.f32.mrf.mxu0 }
  0xfa   : > { %v506_v42 = vpop.f32.mrf.mxu1  ;;  %v479_v44 = vadd.f32 %v478_v41, %v368_v40 }
  0xfb   : > { %v507_v46 = vadd.f32 %v506_v42, %v368_v40  ;;  %v650_v40 = vlaneseq }
  0xfc   : > { %v523_v55 = vmax.f32 %v479_v44, 0.0 }
  0xfd   : > { %v524_v59 = vmax.f32 %v507_v46, 0.0  ;;  %vm652_vm4 = vcmp.lt.s32.totalorder %v650_v40, 256 }
 0x101   : > { %v480_v47 = vpop.f32.mrf.mxu0 }
 0x102   : > { %v481_v49 = vadd.f32 %v480_v47, %v373_v39  ;;  %v508_v50 = vpop.f32.mrf.mxu1 }
 0x103   : > { %v509_v53 = vadd.f32 %v508_v50, %v373_v39 }
 0x104   : > { %v525_v56 = vmax.f32 %v481_v49, 0.0 }
 0x105   : > { %v526_v60 = vmax.f32 %v509_v53, 0.0 }
 0x106   : > { %v533_v63 = vpack.c.bf16 %v525_v56, %v523_v55 }
 0x107   : > { %v534_v2 = vpack.c.bf16 %v526_v60, %v524_v59 }
 0x108   : > { %572 = vmatpush.bf16.msrb.mxu2 %v533_v63 }
 0x109   : > { %586 = vmatpush.bf16.msrb.mxu3 %v534_v2 }
 0x10c   : > { %573 = vmatpush.bf16.msrb.mxu2 %v531_v8 }
 0x10d   : > { %587 = vmatpush.bf16.msrb.mxu3 %v532_v10 }
 0x110   : > { %574 = vmatpush.bf16.msrb.mxu2 %v529_v15 }
 0x111   : > { %588 = vmatpush.bf16.msrb.mxu3 %v530_v16 }
 0x113   : > { %761 = vmatmul.msk.bf16.vlgmr.msrb.gmra.mxu2 %vm556_vm2, %v760_v17 }
 0x114   : > { %762 = vmatmul.msk.bf16.vlgmr.msrb.gmra.mxu3 %vm556_vm2, %v760_v17 }
 0x196   : > { %v576_v18 = vpop.f32.mrf.mxu2 }
 0x197   : > { %v590_v19 = vpop.f32.mrf.mxu3  ;;  %v577_v21 = vadd.f32 %v576_v18, %v544_v20 }
 0x198   : > { %v591_v23 = vadd.f32 %v590_v19, %v544_v20 }
 0x199   : > { %v595_v28 = vmax.f32 %v577_v21, 0.0 }
 0x19a   : > { %v596_v30 = vmax.f32 %v591_v23, 0.0 }
 0x19e   : > { %v578_v24 = vpop.f32.mrf.mxu2 }
 0x19f   : > { %v579_v25 = vadd.f32 %v578_v24, %v549_v22  ;;  %v592_v26 = vpop.f32.mrf.mxu3 }
 0x1a0   : > { %v593_v27 = vadd.f32 %v592_v26, %v549_v22 }
 0x1a1   : > { %v597_v29 = vmax.f32 %v579_v25, 0.0 }
 0x1a2   : > { %v598_v31 = vmax.f32 %v593_v27, 0.0 }
 0x1a3   : > { %v599_v32 = vpack.c.bf16 %v597_v29, %v595_v28 }
 0x1a4   : > { %v600_v33 = vpack.c.bf16 %v598_v31, %v596_v30 }
 0x1a5   : > { %v614_v34 = vsel %vm612_vm3, %v599_v32, 0 }
 0x1a6   : > { %626 = vmatpush.bf16.msra.mxu2 %v614_v34  ;;  %v617_v35 = vsel %vm612_vm3, %v600_v33, 0 }
 0x1a7   : > { %639 = vmatpush.bf16.msra.mxu3 %v617_v35 }
 0x1a9   : > { %763 = vmatmul.msk.bf16.vlgmr.msra.gmra.mxu2 %vm398_vm0, %v601_v36 }
 0x1aa   : > { %764 = vmatmul.msk.bf16.vlgmr.msra.gmra.mxu3 %vm398_vm0, %v601_v36 }
 0x22c   : > { %v628_v39 = vpop.f32.mrf.mxu2 }
 0x22d   : > { %v641_v41 = vpop.f32.mrf.mxu3  ;;  %v629_v43 = vadd.f32 %v628_v39, %v608_v38 }
 0x22e   : > { %v642_v42 = vadd.f32 %v641_v41, %v608_v38 }
 0x230   : > { %v647_v44 = vrot.slane %v642_v42, 7 }
 0x232   : > { %v648_v45 = vsel %vm560_vm1, %v629_v43, %v647_v44 }
 0x233   : > { %654 = vst.msk [vmem:[%s274_s9] sm:$0x3] %vm652_vm4, %v648_v45 }
 0x234   : > { %v630_v46 = vpop.f32.mrf.mxu2 }
 0x235   : > { %859 = shalt.err (!%p856_p3)
}
 0x236   : > { %789 = dma.vmem_to_hbm [thread:$0]  (%p978_p5), %s669_s10, 32, %s671_s14, %s656_s6   ;;  %v643_v47 = vpop.f32.mrf.mxu3 }
 0x237 PF: > { %p795_p4 = scmp.ge.s32.totalorder %s894_s29, 2  ;;  %s682_s21 = sand.u32 1, %s882_s26  }
 0x238   : > { %s683_s23 = scalar_lea.sflag [#allocation4], %s682_s21 }
 0x239   : > { %p792_p7 = pnand %p795_p4, %p982_p6 }
 0x23b   : > { %p793_p8 = pneg %p792_p7 }
 0x23d   : > { %877 = dma.done.wait (%p793_p8), %s683_s23, 32  }
 0x23e   : > { %879 = vsyncadd (%p793_p8), %s683_s23, 4294967264  ;;  %p19_p9 = scmp.ge.s32.totalorder %s965_s8, 4   ;;  %s1145_s26 = smov %s886_s27 }
 0x23f   : > { %s1146_s27 = smov %s890_s28  ;;  %s1147_s28 = smov %s976_s11 }
 0x240   : > { %s1148_s29 = smov %s965_s8  ;;  %21 = sbr.rel (!%p19_p9) target bundleno = 6 (0x6), region = 83 }
 0x245   :  { %689 = vsyncpa [#allocation4], 1 }
 0x246   :  { %691 = vsyncpa [#allocation4 + $0x1], 1 }

</bundles_post_ra>
